<compile_context>
chip_gen: v7x
topology: tpu7x:2x2x1
jax: 0.10.0
libtpu: 0.0.40
codegen_flags: <defaults>
</compile_context>

<pallas_src>
import functools

import jax
import jax.numpy as jnp
from jax.experimental import pallas as pl
from jax.experimental.pallas import tpu as pltpu


def _round_up(x, m):
    return ((x + m - 1) // m) * m


def _cdiv(a, b):
    return -(-a // b)


def _supcon_kernel(anchor_ref, contrast_ref, alab_ref, clab_ref, pcnt_ref, out_ref,
                   m_ref, l_ref, sml_ref,
                   *, ta, tn, loss_scale, num_anchor, num_contrast,
                   mask_pad_cols, mask_pad_rows):
    i = pl.program_id(0)                 # anchor tile    ("parallel")
    j = pl.program_id(1)                 # contrast tile  ("arbitrary", reduction, last)
    last_j = pl.num_programs(1) - 1

    @pl.when(j == 0)
    def _init():
        m_ref[...] = jnp.full((ta, 1), -1e30, dtype=jnp.float32)
        l_ref[...] = jnp.zeros((ta, 1), dtype=jnp.float32)
        sml_ref[...] = jnp.zeros((ta, 1), dtype=jnp.float32)

    # raw logits = (anchor / temperature) @ contrast^T.  1/temperature was folded into
    # the anchor features in the wrapper; contrast arrives pre-transposed as [D, TN],
    # so this is a natural [TA,K]x[K,TN] MXU matmul with f32 accumulation.
    raw = jnp.dot(anchor_ref[...], contrast_ref[...],
                  preferred_element_type=jnp.float32)             # [TA, TN] f32

    # Online logsumexp carry.  The running max may include self / padded columns —
    # that's fine: it cancels exactly in lse = m + log(l) (the PyTorch code likewise
    # subtracts the detached row max, which cancels in the final loss).
    m_prev = m_ref[...]
    m_new = jnp.maximum(m_prev, jnp.max(raw, axis=1, keepdims=True))
    alpha = jnp.exp(m_prev - m_new)
    m_ref[...] = m_new
    e = jnp.exp(raw - m_new)                                      # EUP; shared by both paths

    # Positive-pair mask rebuilt in-kernel from int32 labels.  Padded contrast columns
    # carry a sentinel label (never matches real labels), padded anchor rows carry a
    # different sentinel and are overwritten at finalize, so no validity compares here.
    same_label = alab_ref[...] == clab_ref[...]                   # [TA,1]==[1,TN] -> [TA,TN]

    # Mask machinery is only needed when this tile touches the self-contrast diagonal
    # or (statically known) contains padded contrast columns (only the last j tile).
    diag_hit = jnp.logical_and(i * ta < (j + 1) * tn, j * tn < (i + 1) * ta)
    edge = jnp.logical_or(diag_hit, j == last_j) if mask_pad_cols else diag_hit

    @pl.when(edge)
    def _masked():
        row_ids = i * ta + jax.lax.broadcasted_iota(jnp.int32, (ta, tn), 0)
        col_ids = j * tn + jax.lax.broadcasted_iota(jnp.int32, (ta, tn), 1)
        not_self = row_ids != col_ids
        keep = not_self
        if mask_pad_cols:                         # static flag
            keep = jnp.logical_and(keep, col_ids < num_contrast)
        l_ref[...] = l_ref[...] * alpha + jnp.sum(
            jnp.where(keep, e, 0.0), axis=1, keepdims=True)
        pos = jnp.logical_and(same_label, not_self)
        sml_ref[...] += jnp.sum(jnp.where(pos, raw, 0.0), axis=1, keepdims=True)

    @pl.when(jnp.logical_not(edge))
    def _fast():                                  # interior tile: no iotas, no self mask
        l_ref[...] = l_ref[...] * alpha + jnp.sum(e, axis=1, keepdims=True)
        sml_ref[...] += jnp.sum(jnp.where(same_label, raw, 0.0),
                                axis=1, keepdims=True)

    @pl.when(j == last_j)
    def _finalize():
        lse = m_ref[...] + jnp.log(l_ref[...])                    # [TA, 1]
        # sum(mask*log_prob) = sum(mask*raw) - lse*sum(mask); sum(mask) was computed
        # O(N) in the wrapper (pcnt_ref).  Anchors with genuinely zero positives give
        # 0/0 -> NaN, faithfully matching PyTorch.
        mean_log_prob_pos = sml_ref[...] / pcnt_ref[...] - lse
        loss_rows = loss_scale * mean_log_prob_pos
        if mask_pad_rows:                         # static flag; only if A_pad > A
            rows = i * ta + jax.lax.broadcasted_iota(jnp.int32, (ta, 1), 0)
            loss_rows = jnp.where(rows < num_anchor, loss_rows, 0.0)
        out_ref[...] = loss_rows


def supcon_loss(features, labels=None, mask=None, *,
                temperature=0.07, contrast_mode='all', base_temperature=0.07,
                compute_dtype=jnp.float32, ta_target=512, tn_target=512):
    """JAX/Pallas equivalent of SupConLoss.forward (returns a scalar loss)."""
    features = jnp.asarray(features)
    if features.ndim < 3:
        raise ValueError('`features` needs to be [bsz, n_views, ...], '
                         'at least 3 dimensions are required')
    bsz, n_views = features.shape[0], features.shape[1]
    feat = features.reshape(bsz, n_views, -1).astype(jnp.float32)
    D = feat.shape[-1]
    N = bsz * n_views

    if labels is not None and mask is not None:
        raise ValueError('Cannot define both `labels` and `mask`')

    # contrast_feature = cat(unbind(features, dim=1), dim=0)  (view-major ordering)
    contrast_feature = jnp.transpose(feat, (1, 0, 2)).reshape(N, D)
    if contrast_mode == 'one':
        anchor_feature, anchor_count = feat[:, 0], 1
    elif contrast_mode == 'all':
        anchor_feature, anchor_count = contrast_feature, n_views
    else:
        raise ValueError(f'Unknown mode: {contrast_mode}')
    A = anchor_count * bsz

    if mask is not None:
        # TODO(synk): arbitrary/asymmetric bsz x bsz `mask` is not label-factorable;
        # this rarely-used path runs in plain JAX instead of the Pallas kernel.
        mask_b = jnp.asarray(mask, jnp.float32)
        logits = jnp.matmul(anchor_feature, contrast_feature.T,
                            precision=jax.lax.Precision.HIGHEST) / temperature
        logits = logits - jax.lax.stop_gradient(jnp.max(logits, axis=1, keepdims=True))
        logits_mask = 1.0 - jnp.eye(A, N, dtype=jnp.float32)
        full_mask = jnp.tile(mask_b, (anchor_count, n_views)) * logits_mask
        exp_logits = jnp.exp(logits) * logits_mask
        log_prob = logits - jnp.log(jnp.sum(exp_logits, axis=1, keepdims=True))
        mlpp = jnp.sum(full_mask * log_prob, axis=1) / jnp.sum(full_mask, axis=1)
        return jnp.mean(-(temperature / base_temperature) * mlpp)

    if labels is None:
        labels = jnp.arange(bsz, dtype=jnp.int32)     # eye(bsz) positive mask (SimCLR)
    else:
        labels = jnp.asarray(labels).reshape(-1)
        if labels.shape[0] != bsz:
            raise ValueError('Num of labels does not match num of features')
    labels = labels.astype(jnp.int32)

    contrast_labels = jnp.tile(labels, n_views)       # [N], view-major order
    anchor_labels = contrast_labels[:A]               # [A]

    # Positives per anchor (= sum of the PyTorch mask row) computed once on labels —
    # O(bsz^2) int compares, negligible vs the A*N*D matmul — so the kernel doesn't
    # need a per-step select + XLU lane reduction for sum(mask).
    per_sample_pos = (n_views * jnp.sum(labels[:, None] == labels[None, :], axis=1)
                      - 1).astype(jnp.float32)
    anchor_pos = jnp.tile(per_sample_pos, n_views)[:A]

    # ---- padding / tiling ----------------------------------------------------------
    assert ta_target >= 8 and tn_target % 128 == 0
    D_pad = _round_up(D, 128)                         # lane axis / MXU K dim

    n_anchor_tiles = max(1, _cdiv(A, ta_target))
    if n_anchor_tiles == 1 and A > 8:
        n_anchor_tiles = 2                            # v7x: give the parallel axis 2 tiles
    TA = _round_up(_cdiv(A, n_anchor_tiles), 8)
    A_pad = n_anchor_tiles * TA

    if N > tn_target:
        TN = tn_target
    else:
        TN = _round_up(N, 128)
    N_pad = _round_up(N, TN)

    grid = (A_pad // TA, N_pad // TN)
    mask_pad_cols = bool(N_pad > N)
    mask_pad_rows = bool(A_pad > A)

    # ---- operand preparation -------------------------------------------------------
    INT_SENTINEL = int(jnp.iinfo(jnp.int32).min)
    inv_temp = 1.0 / float(temperature)

    # Fold 1/temperature into the anchor once (O(A*D)) instead of scaling every
    # [TA,TN] logits tile (O(A*N) per contrast pass).
    anchor_p = jnp.pad(anchor_feature * inv_temp,
                       ((0, A_pad - A), (0, D_pad - D))).astype(compute_dtype)
    # Pre-transposed contrast: [D_pad, N_pad], lane-dense along N for the MXU.
    contrast_t = jnp.pad(contrast_feature,
                         ((0, N_pad - N), (0, D_pad - D))).T.astype(compute_dtype)

    a_lab = jnp.pad(anchor_labels, (0, A_pad - A),
                    constant_values=INT_SENTINEL + 1).reshape(A_pad, 1)
    c_lab = jnp.pad(contrast_labels, (0, N_pad - N),
                    constant_values=INT_SENTINEL).reshape(1, N_pad)
    pos_cnt = jnp.pad(anchor_pos, (0, A_pad - A),
                      constant_values=1.0).reshape(A_pad, 1)

    # ---- VMEM budget (generation-aware) ---------------------------------------------
    itemsize = jnp.dtype(compute_dtype).itemsize
    feat_vmem = 2 * (TA + TN) * D_pad * itemsize       # double-buffered feature tiles
    tmp_vmem = 8 * TA * TN * 4                         # [TA,TN] f32 temporaries (generous)
    small_vmem = 8 * (TA + TN) * 4
    needed = int(1.25 * (feat_vmem + tmp_vmem + small_vmem))
    try:
        phys_vmem = pltpu.get_tpu_info().vmem_capacity_bytes
    except Exception:
        phys_vmem = 64 * 1024 * 1024                   # v7x has the smallest VMEM/TC
    vmem_limit = int(max(32 * 1024 * 1024, min(int(0.75 * phys_vmem), needed)))

    kernel = functools.partial(
        _supcon_kernel,
        ta=TA, tn=TN,
        loss_scale=float(-(temperature / base_temperature)),
        num_anchor=A, num_contrast=N,
        mask_pad_cols=mask_pad_cols, mask_pad_rows=mask_pad_rows)

    cost = pl.CostEstimate(
        flops=2 * A_pad * N_pad * D_pad,
        transcendentals=A_pad * N_pad,
        bytes_accessed=(A_pad * D_pad + grid[0] * N_pad * D_pad) * itemsize
                       + (3 * A_pad + N_pad) * 4)

    per_anchor = pl.pallas_call(
        kernel,
        out_shape=jax.ShapeDtypeStruct((A_pad, 1), jnp.float32),
        grid_spec=pltpu.PrefetchScalarGridSpec(
            num_scalar_prefetch=0,
            grid=grid,
            in_specs=[
                pl.BlockSpec((TA, D_pad), lambda i, j: (i, 0)),   # anchor tile (resident over j)
                pl.BlockSpec((D_pad, TN), lambda i, j: (0, j)),   # contrast^T tile [K, N]
                pl.BlockSpec((TA, 1), lambda i, j: (i, 0)),       # anchor labels
                pl.BlockSpec((1, TN), lambda i, j: (0, j)),       # contrast labels
                pl.BlockSpec((TA, 1), lambda i, j: (i, 0)),       # positives per anchor
            ],
            out_specs=pl.BlockSpec((TA, 1), lambda i, j: (i, 0)),
            scratch_shapes=[pltpu.VMEM((TA, 1), jnp.float32)] * 3),
        compiler_params=pltpu.CompilerParams(
            dimension_semantics=("parallel", "arbitrary"),
            vmem_limit_bytes=vmem_limit),
        cost_estimate=cost,
    )(anchor_p, contrast_t, a_lab, c_lab, pos_cnt)

    # loss.view(anchor_count, batch_size).mean() == mean over all A anchor rows
    return jnp.sum(per_anchor[:A, 0]) / A


def _supcon_loss_ref(features, labels=None, *, temperature=0.07, base_temperature=0.07,
                     contrast_mode='all'):
    """Pure-JAX reference mirroring the PyTorch code."""
    bsz, n_views = features.shape[0], features.shape[1]
    feat = features.reshape(bsz, n_views, -1).astype(jnp.float32)
    N = bsz * n_views
    if labels is None:
        base_mask = jnp.eye(bsz, dtype=jnp.float32)
    else:
        labels = labels.reshape(-1, 1)
        base_mask = (labels == labels.T).astype(jnp.float32)
    cf = jnp.transpose(feat, (1, 0, 2)).reshape(N, -1)
    if contrast_mode == 'one':
        af, anchor_count = feat[:, 0], 1
    else:
        af, anchor_count = cf, n_views
    A = anchor_count * bsz
    logits = jnp.matmul(af, cf.T, precision=jax.lax.Precision.HIGHEST) / temperature
    logits = logits - jnp.max(logits, axis=1, keepdims=True)
    full_mask = jnp.tile(base_mask, (anchor_count, n_views))
    lmask = 1.0 - (jnp.arange(N)[None, :] == jnp.arange(A)[:, None]).astype(jnp.float32)
    full_mask = full_mask * lmask
    exp_logits = jnp.exp(logits) * lmask
    log_prob = logits - jnp.log(exp_logits.sum(1, keepdims=True))
    mean_log_prob_pos = (full_mask * log_prob).sum(1) / full_mask.sum(1)
    loss = -(temperature / base_temperature) * mean_log_prob_pos
    return loss.mean()


if __name__ == "__main__":
    key = jax.random.PRNGKey(0)
    k1, k2, k3 = jax.random.split(key, 3)

    # ---- Test 1: small shapes (default tiles; >=2 anchor tiles for megacore) --------
    bsz, n_views, feat_dim = 8, 2, 32
    feats = jax.random.normal(k1, (bsz, n_views, feat_dim), dtype=jnp.float32)
    feats = feats / jnp.linalg.norm(feats, axis=-1, keepdims=True)
    labels = jnp.arange(bsz, dtype=jnp.int32) % 3

    ref = _supcon_loss_ref(feats, labels)
    loss_f32 = jax.block_until_ready(
        supcon_loss(feats, labels=labels, compute_dtype=jnp.float32))
    assert jnp.allclose(loss_f32, ref, rtol=5e-4, atol=5e-4), (loss_f32, ref)

    loss_bf16 = jax.block_until_ready(
        supcon_loss(feats, labels=labels, compute_dtype=jnp.bfloat16))
    assert jnp.allclose(loss_bf16, ref, rtol=5e-2, atol=1.5e-1), (loss_bf16, ref)

    # ---- Test 2: multi-tile grid (exercises both fast interior and masked edge paths)
    bsz2, n_views2, d2 = 200, 2, 40
    feats2 = jax.random.normal(k2, (bsz2, n_views2, d2), dtype=jnp.float32)
    feats2 = feats2 / jnp.linalg.norm(feats2, axis=-1, keepdims=True)
    labels2 = jnp.arange(bsz2, dtype=jnp.int32) % 5
    ref2 = _supcon_loss_ref(feats2, labels2)
    loss2 = jax.block_until_ready(
        supcon_loss(feats2, labels=labels2, compute_dtype=jnp.float32,
                    ta_target=64, tn_target=128))
    assert jnp.allclose(loss2, ref2, rtol=1e-3, atol=1e-3), (loss2, ref2)

    # ---- Test 3: unsupervised SimCLR path (labels=None -> eye mask) ------------------
    ref3 = _supcon_loss_ref(feats, None)
    loss3 = jax.block_until_ready(supcon_loss(feats, compute_dtype=jnp.float32))
    assert jnp.allclose(loss3, ref3, rtol=5e-4, atol=5e-4), (loss3, ref3)

    # ---- Test 4: contrast_mode='one' (A < N, anchor tiling + padded contrast cols) ---
    bsz4, n_views4, d4 = 40, 3, 24
    feats4 = jax.random.normal(k3, (bsz4, n_views4, d4), dtype=jnp.float32)
    feats4 = feats4 / jnp.linalg.norm(feats4, axis=-1, keepdims=True)
    labels4 = jnp.arange(bsz4, dtype=jnp.int32) % 4
    ref4 = _supcon_loss_ref(feats4, labels4, contrast_mode='one')
    loss4 = jax.block_until_ready(
        supcon_loss(feats4, labels=labels4, contrast_mode='one',
                    compute_dtype=jnp.float32, ta_target=16, tn_target=128))
    assert jnp.allclose(loss4, ref4, rtol=1e-3, atol=1e-3), (loss4, ref4)

    print("KERNEL_OK")
</pallas_src>

<mosaic_0001>
module attributes {stable_mosaic.version = 11 : i64} {
  func.func @_supcon_kernel(%arg0: i32, %arg1: i32, %arg2: memref<8x128xf32, #tpu.memory_space<vmem>>, %arg3: memref<128x128xf32, #tpu.memory_space<vmem>>, %arg4: memref<8x1xi32, #tpu.memory_space<vmem>>, %arg5: memref<1x128xi32, #tpu.memory_space<vmem>>, %arg6: memref<8x1xf32, #tpu.memory_space<vmem>>, %arg7: memref<8x1xf32, #tpu.memory_space<vmem>>, %arg8: memref<8x1xf32, #tpu.memory_space<vmem>>, %arg9: memref<8x1xf32, #tpu.memory_space<vmem>>, %arg10: memref<8x1xf32, #tpu.memory_space<vmem>>) attributes {dimension_semantics = [#tpu.dimension_semantics<parallel>, #tpu.dimension_semantics<arbitrary>], iteration_bounds = array<i64: 2, 1>, scalar_prefetch = 0 : i64, scratch_operands = 3 : i64, tpu.core_type = #tpu.core_type<tc>, window_params = [{transform_indices = @transform_0, window_bounds = array<i64: 8, 128>}, {transform_indices = @transform_1, window_bounds = array<i64: 128, 128>}, {transform_indices = @transform_2, window_bounds = array<i64: 8, 1>}, {transform_indices = @transform_3, window_bounds = array<i64: 1, 128>}, {transform_indices = @transform_4, window_bounds = array<i64: 8, 1>}, {transform_indices = @transform_5, window_bounds = array<i64: 8, 1>}]} {
    %c0_i32 = arith.constant 0 : i32
    %0 = arith.cmpi eq, %arg1, %c0_i32 : i32
    %1 = arith.extui %0 : i1 to i32
    %c0_i32_0 = arith.constant 0 : i32
    %2 = arith.cmpi ne, %1, %c0_i32_0 : i32
    scf.if %2 {
      %cst_21 = arith.constant -1.000000e+30 : f32
      %40 = vector.broadcast %cst_21 : f32 to vector<8x1xf32>
      %c0_22 = arith.constant 0 : index
      %c0_23 = arith.constant 0 : index
      %41 = vector.load %arg8[%c0_22, %c0_23] : memref<8x1xf32, #tpu.memory_space<vmem>>, vector<8x1xf32>
      tpu.vector_store %arg8[%c0_22, %c0_23], %40 {strides = array<i32>} : memref<8x1xf32, #tpu.memory_space<vmem>>, vector<8x1xf32>,
      %cst_24 = arith.constant 0.000000e+00 : f32
      %42 = vector.broadcast %cst_24 : f32 to vector<8x1xf32>
      %c0_25 = arith.constant 0 : index
      %c0_26 = arith.constant 0 : index
      %43 = vector.load %arg9[%c0_25, %c0_26] : memref<8x1xf32, #tpu.memory_space<vmem>>, vector<8x1xf32>
      tpu.vector_store %arg9[%c0_25, %c0_26], %42 {strides = array<i32>} : memref<8x1xf32, #tpu.memory_space<vmem>>, vector<8x1xf32>,
      %cst_27 = arith.constant 0.000000e+00 : f32
      %44 = vector.broadcast %cst_27 : f32 to vector<8x1xf32>
      %c0_28 = arith.constant 0 : index
      %c0_29 = arith.constant 0 : index
      %45 = vector.load %arg10[%c0_28, %c0_29] : memref<8x1xf32, #tpu.memory_space<vmem>>, vector<8x1xf32>
      tpu.vector_store %arg10[%c0_28, %c0_29], %44 {strides = array<i32>} : memref<8x1xf32, #tpu.memory_space<vmem>>, vector<8x1xf32>,
    } else {
    }
    %c0 = arith.constant 0 : index
    %c0_1 = arith.constant 0 : index
    %3 = vector.load %arg2[%c0, %c0_1] : memref<8x128xf32, #tpu.memory_space<vmem>>, vector<8x128xf32>
    %c0_2 = arith.constant 0 : index
    %c0_3 = arith.constant 0 : index
    %4 = vector.load %arg3[%c0_2, %c0_3] : memref<128x128xf32, #tpu.memory_space<vmem>>, vector<128x128xf32>
    %cst = arith.constant dense<0.000000e+00> : vector<8x128xf32>
    %5 = tpu.matmul %3, %4, %cst {dimension_numbers = #tpu.dot_dimension_numbers<[1], [0], [0], [1], [0, 0, 1, 1], [], []>} : vector<8x128xf32>, vector<128x128xf32>, vector<8x128xf32> -> vector<8x128xf32>
    %c0_4 = arith.constant 0 : index
    %c0_5 = arith.constant 0 : index
    %6 = vector.load %arg8[%c0_4, %c0_5] : memref<8x1xf32, #tpu.memory_space<vmem>>, vector<8x1xf32>
    %cst_6 = arith.constant dense<0xFF800000> : vector<8xf32>
    %7 = vector.multi_reduction <maximumf>, %5, %cst_6 [1] : vector<8x128xf32> to vector<8xf32>
    %8 = vector.shape_cast %7 : vector<8xf32> to vector<8x1xf32>
    %9 = arith.maximumf %6, %8 : vector<8x1xf32>
    %10 = arith.subf %6, %9 : vector<8x1xf32>
    %11 = math.exp %10 : vector<8x1xf32>
    %c0_7 = arith.constant 0 : index
    %c0_8 = arith.constant 0 : index
    %12 = vector.load %arg8[%c0_7, %c0_8] : memref<8x1xf32, #tpu.memory_space<vmem>>, vector<8x1xf32>
    tpu.vector_store %arg8[%c0_7, %c0_8], %9 {strides = array<i32>} : memref<8x1xf32, #tpu.memory_space<vmem>>, vector<8x1xf32>,
    %13 = vector.broadcast %9 : vector<8x1xf32> to vector<8x128xf32>
    %14 = arith.subf %5, %13 : vector<8x128xf32>
    %15 = math.exp %14 : vector<8x128xf32>
    %c0_9 = arith.constant 0 : index
    %c0_10 = arith.constant 0 : index
    %16 = vector.load %arg4[%c0_9, %c0_10] : memref<8x1xi32, #tpu.memory_space<vmem>>, vector<8x1xi32>
    %c0_11 = arith.constant 0 : index
    %c0_12 = arith.constant 0 : index
    %17 = vector.load %arg5[%c0_11, %c0_12] : memref<1x128xi32, #tpu.memory_space<vmem>>, vector<1x128xi32>
    %18 = vector.broadcast %16 : vector<8x1xi32> to vector<8x128xi32>
    %19 = vector.broadcast %17 : vector<1x128xi32> to vector<8x128xi32>
    %20 = arith.cmpi eq, %18, %19 : vector<8x128xi32>
    %c8_i32 = arith.constant 8 : i32
    %21 = arith.muli %arg0, %c8_i32 : i32
    %c1_i32 = arith.constant 1 : i32
    %22 = arith.addi %arg1, %c1_i32 : i32
    %c128_i32 = arith.constant 128 : i32
    %23 = arith.muli %22, %c128_i32 : i32
    %24 = arith.cmpi slt, %21, %23 : i32
    %c128_i32_13 = arith.constant 128 : i32
    %25 = arith.muli %arg1, %c128_i32_13 : i32
    %c1_i32_14 = arith.constant 1 : i32
    %26 = arith.addi %arg0, %c1_i32_14 : i32
    %c8_i32_15 = arith.constant 8 : i32
    %27 = arith.muli %26, %c8_i32_15 : i32
    %28 = arith.cmpi slt, %25, %27 : i32
    %29 = arith.andi %24, %28 : i1
    %c0_i32_16 = arith.constant 0 : i32
    %30 = arith.cmpi eq, %arg1, %c0_i32_16 : i32
    %31 = arith.ori %29, %30 : i1
    %32 = arith.extui %31 : i1 to i32
    %c0_i32_17 = arith.constant 0 : i32
    %33 = arith.cmpi ne, %32, %c0_i32_17 : i32
    scf.if %33 {
      %c8_i32_21 = arith.constant 8 : i32
      %40 = arith.muli %arg0, %c8_i32_21 : i32
      %41 = tpu.iota {dimensions = array<i32: 0>} : vector<8x128xi32>
      %42 = vector.broadcast %40 : i32 to vector<8x128xi32>
      %43 = arith.addi %42, %41 : vector<8x128xi32>
      %c128_i32_22 = arith.constant 128 : i32
      %44 = arith.muli %arg1, %c128_i32_22 : i32
      %45 = tpu.iota {dimensions = array<i32: 1>} : vector<8x128xi32>
      %46 = vector.broadcast %44 : i32 to vector<8x128xi32>
      %47 = arith.addi %46, %45 : vector<8x128xi32>
      %48 = arith.cmpi ne, %43, %47 : vector<8x128xi32>
      %c16_i32 = arith.constant 16 : i32
      %49 = vector.broadcast %c16_i32 : i32 to vector<8x128xi32>
      %50 = arith.cmpi slt, %47, %49 : vector<8x128xi32>
      %51 = arith.andi %48, %50 : vector<8x128xi1>
      %c0_23 = arith.constant 0 : index
      %c0_24 = arith.constant 0 : index
      %52 = vector.load %arg9[%c0_23, %c0_24] : memref<8x1xf32, #tpu.memory_space<vmem>>, vector<8x1xf32>
      %53 = arith.mulf %52, %11 : vector<8x1xf32>
      %cst_25 = arith.constant 0.000000e+00 : f32
      %54 = vector.broadcast %cst_25 : f32 to vector<8x128xf32>
      %55 = arith.select %51, %15, %54 : vector<8x128xi1>, vector<8x128xf32>
      %cst_26 = arith.constant dense<0.000000e+00> : vector<8xf32>
      %56 = vector.multi_reduction <add>, %55, %cst_26 [1] : vector<8x128xf32> to vector<8xf32>
      %57 = vector.shape_cast %56 : vector<8xf32> to vector<8x1xf32>
      %58 = arith.addf %53, %57 : vector<8x1xf32>
      %c0_27 = arith.constant 0 : index
      %c0_28 = arith.constant 0 : index
      %59 = vector.load %arg9[%c0_27, %c0_28] : memref<8x1xf32, #tpu.memory_space<vmem>>, vector<8x1xf32>
      tpu.vector_store %arg9[%c0_27, %c0_28], %58 {strides = array<i32>} : memref<8x1xf32, #tpu.memory_space<vmem>>, vector<8x1xf32>,
      %60 = arith.andi %20, %48 : vector<8x128xi1>
      %c0_29 = arith.constant 0 : index
      %c0_30 = arith.constant 0 : index
      %61 = vector.load %arg10[%c0_29, %c0_30] : memref<8x1xf32, #tpu.memory_space<vmem>>, vector<8x1xf32>
      %cst_31 = arith.constant 0.000000e+00 : f32
      %62 = vector.broadcast %cst_31 : f32 to vector<8x128xf32>
      %63 = arith.select %60, %5, %62 : vector<8x128xi1>, vector<8x128xf32>
      %cst_32 = arith.constant dense<0.000000e+00> : vector<8xf32>
      %64 = vector.multi_reduction <add>, %63, %cst_32 [1] : vector<8x128xf32> to vector<8xf32>
      %65 = vector.shape_cast %64 : vector<8xf32> to vector<8x1xf32>
      %66 = arith.addf %61, %65 : vector<8x1xf32>
      %c0_33 = arith.constant 0 : index
      %c0_34 = arith.constant 0 : index
      %67 = vector.load %arg10[%c0_33, %c0_34] : memref<8x1xf32, #tpu.memory_space<vmem>>, vector<8x1xf32>
      tpu.vector_store %arg10[%c0_33, %c0_34], %66 {strides = array<i32>} : memref<8x1xf32, #tpu.memory_space<vmem>>, vector<8x1xf32>,
    } else {
    }
    %true = arith.constant true
    %34 = arith.xori %31, %true : i1
    %35 = arith.extui %34 : i1 to i32
    %c0_i32_18 = arith.constant 0 : i32
    %36 = arith.cmpi ne, %35, %c0_i32_18 : i32
    scf.if %36 {
      %c0_21 = arith.constant 0 : index
      %c0_22 = arith.constant 0 : index
      %40 = vector.load %arg9[%c0_21, %c0_22] : memref<8x1xf32, #tpu.memory_space<vmem>>, vector<8x1xf32>
      %41 = arith.mulf %40, %11 : vector<8x1xf32>
      %cst_23 = arith.constant dense<0.000000e+00> : vector<8xf32>
      %42 = vector.multi_reduction <add>, %15, %cst_23 [1] : vector<8x128xf32> to vector<8xf32>
      %43 = vector.shape_cast %42 : vector<8xf32> to vector<8x1xf32>
      %44 = arith.addf %41, %43 : vector<8x1xf32>
      %c0_24 = arith.constant 0 : index
      %c0_25 = arith.constant 0 : index
      %45 = vector.load %arg9[%c0_24, %c0_25] : memref<8x1xf32, #tpu.memory_space<vmem>>, vector<8x1xf32>
      tpu.vector_store %arg9[%c0_24, %c0_25], %44 {strides = array<i32>} : memref<8x1xf32, #tpu.memory_space<vmem>>, vector<8x1xf32>,
      %c0_26 = arith.constant 0 : index
      %c0_27 = arith.constant 0 : index
      %46 = vector.load %arg10[%c0_26, %c0_27] : memref<8x1xf32, #tpu.memory_space<vmem>>, vector<8x1xf32>
      %cst_28 = arith.constant 0.000000e+00 : f32
      %47 = vector.broadcast %cst_28 : f32 to vector<8x128xf32>
      %48 = arith.select %20, %5, %47 : vector<8x128xi1>, vector<8x128xf32>
      %cst_29 = arith.constant dense<0.000000e+00> : vector<8xf32>
      %49 = vector.multi_reduction <add>, %48, %cst_29 [1] : vector<8x128xf32> to vector<8xf32>
      %50 = vector.shape_cast %49 : vector<8xf32> to vector<8x1xf32>
      %51 = arith.addf %46, %50 : vector<8x1xf32>
      %c0_30 = arith.constant 0 : index
      %c0_31 = arith.constant 0 : index
      %52 = vector.load %arg10[%c0_30, %c0_31] : memref<8x1xf32, #tpu.memory_space<vmem>>, vector<8x1xf32>
      tpu.vector_store %arg10[%c0_30, %c0_31], %51 {strides = array<i32>} : memref<8x1xf32, #tpu.memory_space<vmem>>, vector<8x1xf32>,
    } else {
    }
    %c0_i32_19 = arith.constant 0 : i32
    %37 = arith.cmpi eq, %arg1, %c0_i32_19 : i32
    %38 = arith.extui %37 : i1 to i32
    %c0_i32_20 = arith.constant 0 : i32
    %39 = arith.cmpi ne, %38, %c0_i32_20 : i32
    scf.if %39 {
      %c0_21 = arith.constant 0 : index
      %c0_22 = arith.constant 0 : index
      %40 = vector.load %arg8[%c0_21, %c0_22] : memref<8x1xf32, #tpu.memory_space<vmem>>, vector<8x1xf32>
      %c0_23 = arith.constant 0 : index
      %c0_24 = arith.constant 0 : index
      %41 = vector.load %arg9[%c0_23, %c0_24] : memref<8x1xf32, #tpu.memory_space<vmem>>, vector<8x1xf32>
      %42 = math.log %41 : vector<8x1xf32>
      %43 = arith.addf %40, %42 : vector<8x1xf32>
      %c0_25 = arith.constant 0 : index
      %c0_26 = arith.constant 0 : index
      %44 = vector.load %arg10[%c0_25, %c0_26] : memref<8x1xf32, #tpu.memory_space<vmem>>, vector<8x1xf32>
      %c0_27 = arith.constant 0 : index
      %c0_28 = arith.constant 0 : index
      %45 = vector.load %arg6[%c0_27, %c0_28] : memref<8x1xf32, #tpu.memory_space<vmem>>, vector<8x1xf32>
      %46 = arith.divf %44, %45 : vector<8x1xf32>
      %47 = arith.subf %46, %43 : vector<8x1xf32>
      %cst_29 = arith.constant -1.000000e+00 : f32
      %48 = vector.broadcast %cst_29 : f32 to vector<8x1xf32>
      %49 = arith.mulf %48, %47 : vector<8x1xf32>
      %c0_30 = arith.constant 0 : index
      %c0_31 = arith.constant 0 : index
      %50 = vector.load %arg7[%c0_30, %c0_31] : memref<8x1xf32, #tpu.memory_space<vmem>>, vector<8x1xf32>
      tpu.vector_store %arg7[%c0_30, %c0_31], %49 {strides = array<i32>} : memref<8x1xf32, #tpu.memory_space<vmem>>, vector<8x1xf32>,
    } else {
    }
    return
  }
  func.func @transform_0(%arg0: i32, %arg1: i32) -> (i32, i32) {
    %c0_i32 = arith.constant 0 : i32
    %c0_i32_0 = arith.constant 0 : i32
    return %arg0, %c0_i32 : i32, i32
  }
  func.func @transform_1(%arg0: i32, %arg1: i32) -> (i32, i32) {
    %c0_i32 = arith.constant 0 : i32
    %c0_i32_0 = arith.constant 0 : i32
    return %c0_i32, %arg1 : i32, i32
  }
  func.func @transform_2(%arg0: i32, %arg1: i32) -> (i32, i32) {
    %c0_i32 = arith.constant 0 : i32
    %c0_i32_0 = arith.constant 0 : i32
    return %arg0, %c0_i32 : i32, i32
  }
  func.func @transform_3(%arg0: i32, %arg1: i32) -> (i32, i32) {
    %c0_i32 = arith.constant 0 : i32
    %c0_i32_0 = arith.constant 0 : i32
    return %c0_i32, %arg1 : i32, i32
  }
  func.func @transform_4(%arg0: i32, %arg1: i32) -> (i32, i32) {
    %c0_i32 = arith.constant 0 : i32
    %c0_i32_0 = arith.constant 0 : i32
    return %arg0, %c0_i32 : i32, i32
  }
  func.func @transform_5(%arg0: i32, %arg1: i32) -> (i32, i32) {
    %c0_i32 = arith.constant 0 : i32
    %c0_i32_0 = arith.constant 0 : i32
    return %arg0, %c0_i32 : i32, i32
  }
}

</mosaic_0001>

<bundles_post_ra>
// kernel: tpu_custom_call.1
= control target key start
LH: loop header
LB: loop body
LE: loop exit
PB: predicated region body
PF: predicated region fallthrough
CT: control target
= control target key end

     0   :  { %10 = vsyncpa [#allocation6], 0  ;;  %s847_s18 = smov 0   ;;  %s849_s19 = smov 0   ;;  %s946_s0 = inlined_call_operand.vmem [shape: f32[16,128], index: 0, kind: input, shape index: {}]   ;;  %s947_s1 = inlined_call_operand.hbm [shape: f32[128,128], index: 1, kind: input, shape index: {}]   ;;  %s948_s2 = inlined_call_operand.vmem [shape: s32[16,1], index: 2, kind: input, shape index: {}]   ;;  %s949_s3 = inlined_call_operand.vmem [shape: s32[1,128], index: 3, kind: input, shape index: {}]   ;;  %s950_s4 = inlined_call_operand.vmem [shape: f32[16,1], index: 4, kind: input, shape index: {}]   ;;  %s951_s5 = inlined_call_operand.vmem [shape: f32[16,1], index: 5, kind: output, shape index: {}]  }
   0x1   :  { %s851_s20 = smov 0  }
   0x2 LB: > { %s605_s21 = sadd.s32 4294967295, %s807_s20   ;;  %s28_s22 = sadd.s32 1, %s803_s19  ;;  %s807_s20 = sphi %s851_s20, %s16_s20   ;;  %s803_s19 = sphi %s849_s19, %s961_s19   ;;  %s799_s18 = sphi %s847_s18, %s960_s18  }
   0x3   : > { %p30_p0 = scmp.ge.s32.totalorder %s28_s22, 2  ;;  %p607_p1 = scmp.ge.s32.totalorder %s807_s20, 1 }
   0x4   : > { %p189_p2 = scmp.lt.s32.totalorder %s807_s20, 3  ;;  %p872_p4 = scmp.eq.s32.totalorder %s605_s21, 0 }
   0x5   : > { %s963_s22 = smov (%p30_p0, %s28_s22), 0  ;;  %s809_s25 = smov [#allocation5]  }
   0x6   : > { %p868_p3 = pnand %p607_p1, %p189_p2  ;;  %s203_s26 = sshll.u32 %s809_s25, 4  ;;  %s204_s26 = int_to_ptr.vmem [resolvable:$true] %s203_s26 }
   0x7   : > { %s956_s24 = scalar_select %p872_p4, 1, 0 }
   0x8   : > { %s955_s23 = scalar_select %p868_p3, 1, 0 }
   0x9   : > { %p705_p5 = pneg %p868_p3  ;;  %s753_s30 = scalar_lea.hbm %s947_s1, 2048 }
   0xa   : > { %p754_p7 = scmp.ne.s32.totalorder %s947_s1, %s753_s30  ;;  %p760_p11 = scmp.lt.u32.totalorder %s753_s30, %s947_s1 }
   0xb   : > { %p880_p6 = pnand %p872_p4, %p705_p5 }
   0xd   : > { %p755_p8 = pneg %p880_p6 }
   0xf   : > { %p756_p9 = pnand %p755_p8, %p754_p7 }
  0x11   : > { %p757_p10 = pneg %p756_p9 }
  0x13   : > { %p762_p12 = pnand %p760_p11, %p757_p10 }
  0x15   : > { %765 = shalt.err (!%p762_p12)
}
  0x16   : > { %s766_s10 = scalar_lea.vmem %s204_s26, 2048  ;;  %p774_p2 = scmp.lt.s32.totalorder %s204_s26, %s204_s26 }
  0x17   : > { %p767_p13 = scmp.ne.s32.totalorder %s204_s26, %s766_s10  ;;  %p775_p5 = scmp.lt.s32.totalorder %s766_s10, %s766_s10 }
  0x19   : > { %p769_p0 = pnand %p767_p13, %p755_p8  ;;  %p776_p4 = por %p775_p5, %p774_p2 }
  0x1b   : > { %p770_p1 = pneg %p769_p0 }
  0x1d   : > { %p777_p3 = pnand %p776_p4, %p770_p1 }
  0x1f   : > { %780 = shalt.err (!%p777_p3)
}
  0x20   : > { %s810_s11 = smov 128   ;;  %s811_s12 = smov 8  }
  0x21   : > { %708 = dma.hbm_to_vmem [thread:$0]  (!%p880_p6), %s947_s1, 2048, %s204_s26, [#allocation6], %s810_s11, %s810_s11, %s811_s12  }
  0x22   : > { %p958_p7 = scmp.ne.s32.totalorder %s955_s23, 0 }
  0x23   : > { %p959_p9 = scmp.ne.s32.totalorder (!%p958_p7), %s956_s24, 0 }
  0x24   : > { %246 = sbr.rel (%p958_p7) target bundleno = 751 (0x2ef), region = 40 }
  0x2b   : > { %794 = dma.done.wait (%p959_p9), [#allocation6], 2048  }
  0x2c   : > { %796 = vsyncadd (%p959_p9), [#allocation6], 4294965248  ;;  %vm306_vm0 = vcmask 7168   ;;  %v812_v0 = vmov 0.0|0.0   ;;  %v813_v1 = vmov 0.0   ;;  %vm814_vm1 = vmmov 0  }
  0x2d   : > { %677 = vmatprep.subr.bf16.mxu0 %v812_v0  ;;  %308 = vst.msk [vmem:[#allocation3] sm:$0xff] %vm306_vm0, %v813_v1  ;;  %309 = vst.msk [vmem:[#allocation4] sm:$0xff] %vm306_vm0, %v813_v1  ;;  %674 = vmatprep.mubr.msk.f32.mxu0 %vm814_vm1, %v813_v1  ;;  %p283_p3 = scmp.lt.s32.totalorder %s799_s18, 1  ;;  %v815_v2 = vmov 0   ;;  %v311_v3 = vld [vmem:[#allocation5] sm:$0xff]  ;;  %v312_v4 = vld [vmem:[#allocation5 + $0x8] sm:$0xff]  ;;  %v438_v37 = vlaneseq }
  0x2e   : > { %744 = vset.pattern.permute.xlu1 %v815_v2  ;;  %743 = vset.pattern.permute.xlu0 %v815_v2  ;;  %v313_v5 = vld [vmem:[#allocation5 + $0x10] sm:$0xff]  ;;  %v678_v6 = vpack.c.bf16 %v312_v4, %v311_v3  ;;  %v314_v7 = vld [vmem:[#allocation5 + $0x18] sm:$0xff]  ;;  %v315_v9 = vld [vmem:[#allocation5 + $0x20] sm:$0xff]  ;;  %v816_v29 = vmov -1e+30   ;;  %s618_s27 = sshll.u32 %s799_s18, 3 }
  0x2f   : > { %s284_s15 = scalar_select %p283_p3, %s799_s18, 1  ;;  %v681_v8 = vpack.c.bf16 %v314_v7, %v313_v5  ;;  %v316_v10 = vld [vmem:[#allocation5 + $0x28] sm:$0xff]  ;;  %v317_v13 = vld [vmem:[#allocation5 + $0x30] sm:$0xff]  ;;  %v318_v14 = vld [vmem:[#allocation5 + $0x38] sm:$0xff]  ;;  %307 = vst.msk [vmem:[#allocation2] sm:$0xff] %vm306_vm0, %v816_v29  ;;  %v439_v40 = vshrl.u32 %v438_v37, 7  ;;  %v440_v41 = vstv %s618_s27 }
  0x30   : > { %679 = vmatpush3.bf16.msra.mxu0 %v678_v6  ;;  %v684_v12 = vpack.c.bf16 %v316_v10, %v315_v9  ;;  %v687_v15 = vpack.c.bf16 %v318_v14, %v317_v13  ;;  %v319_v16 = vld [vmem:[#allocation5 + $0x40] sm:$0xff]  ;;  %v320_v17 = vld [vmem:[#allocation5 + $0x48] sm:$0xff]  ;;  %v321_v19 = vld [vmem:[#allocation5 + $0x50] sm:$0xff]  ;;  %v443_v43 = vand.u32 127, %v438_v37 }
  0x31   : > { %s910_s16 = sshll.u32 %s284_s15, 3  ;;  %680 = vmatprep.subr.bf16.mxu0 %v812_v0  ;;  %v690_v18 = vpack.c.bf16 %v320_v17, %v319_v16  ;;  %v322_v20 = vld [vmem:[#allocation5 + $0x58] sm:$0xff]  ;;  %v323_v22 = vld [vmem:[#allocation5 + $0x60] sm:$0xff]  ;;  %v324_v23 = vld [vmem:[#allocation5 + $0x68] sm:$0xff]  ;;  %v441_v42 = vadd.s32 %v440_v41, %v439_v40 }
  0x32   : > { %s290_s23 = scalar_lea.vmem %s948_s2, %s910_s16  ;;  %v693_v21 = vpack.c.bf16 %v322_v20, %v321_v19  ;;  %v696_v24 = vpack.c.bf16 %v324_v23, %v323_v22  ;;  %v325_v25 = vld [vmem:[#allocation5 + $0x70] sm:$0xff]  ;;  %v326_v26 = vld [vmem:[#allocation5 + $0x78] sm:$0xff]  ;;  %s286_s26 = scalar_lea.vmem %s946_s0, %s910_s16  ;;  %vm447_vm2 = vcmp.lt.s32.totalorder %v443_v43, 16  ;;  %v617_v44 = vld [vmem:[%s949_s3] ss:$0 sm:$0xff] }
  0x33   : > { %v414_v11 = vld [vmem:[%s290_s23] sm:$0xff]  ;;  %v699_v27 = vpack.c.bf16 %v326_v26, %v325_v25  ;;  %vm446_vm3 = vcmp.ne.s32.totalorder %v441_v42, %v443_v43  ;;  %s297_s6 = scalar_lea.vmem %s950_s4, %s910_s16  ;;  %s301_s9 = scalar_lea.vmem %s951_s5, %s910_s16 }
  0x34   : > { %682 = vmatpush3.bf16.msra.mxu0 %v681_v8  ;;  %417 = vperm.xlu1 %744, %v414_v11   ;;  %v310_v28 = vld [vmem:[%s286_s26] sm:$0xff]  ;;  %vm448_vm4 = vmand %vm446_vm3, %vm447_vm2  ;;  %v449_v51 = vld [vmem:[#allocation3] sm:$0xff] }
  0x35   : > { %683 = vmatprep.subr.bf16.mxu0 %v812_v0  ;;  %v457_v55 = vld [vmem:[#allocation4] sm:$0xff]  ;;  %v487_v58 = vld [vmem:[%s297_s6] sm:$0xff] }
  0x36   : > { %v397_v32 = vld [vmem:[#allocation2] sm:$0xff] }
  0x38   : > { %685 = vmatpush3.bf16.msra.mxu0 %v684_v12 }
  0x39   : > { %686 = vmatprep.subr.bf16.mxu0 %v812_v0 }
  0x3c   : > { %688 = vmatpush3.bf16.msra.mxu0 %v687_v15 }
  0x3d   : > { %689 = vmatprep.subr.bf16.mxu0 %v812_v0 }
  0x40   : > { %691 = vmatpush3.bf16.msra.mxu0 %v690_v18 }
  0x41   : > { %692 = vmatprep.subr.bf16.mxu0 %v812_v0 }
  0x44   : > { %694 = vmatpush3.bf16.msra.mxu0 %v693_v21 }
  0x45   : > { %695 = vmatprep.subr.bf16.mxu0 %v812_v0 }
  0x48   : > { %697 = vmatpush3.bf16.msra.mxu0 %v696_v24 }
  0x49   : > { %698 = vmatprep.subr.bf16.mxu0 %v812_v0 }
  0x4c   : > { %700 = vmatpush3.bf16.msra.mxu0 %v699_v27 }
  0x4f   : > { %675 = vmatmul.mubr.f32.vlgmr.msra.gmra.mrb[0].mxu0 %v310_v28 }
  0xb3   : > { %v418_v45 = vpop.permute.xlu1 %417 }
  0xb4   : > { %vm423_vm5 = vcmp.eq.s32.totalorder %v418_v45, %v617_v44 }
  0xb5   : > { %vm456_vm6 = vmand %vm423_vm5, %vm446_vm3 }
 0x122   : > { %v393_v30 = vpop.f32.mrb[0].mxu0 }
 0x123   : > { %398 = vmax.xlane.f32.xlu0 %v393_v30  ;;  %v676_v31 = vpop.f32.mrb[1].mxu0  ;;  %v458_v48 = vsel %vm456_vm6, %v393_v30, 0.0 }
 0x1b0   : > { %v399_v33 = vpop.xlane.xlu0 %398 }
 0x1b1   : > { %v400_v34 = vmax.f32 %v397_v32, %v399_v33 }
 0x1b3   : > { %v401_v35 = vsub.f32 %v397_v32, %v400_v34  ;;  %405 = vst.msk [vmem:[#allocation2] sm:$0xff] %vm306_vm0, %v400_v34  ;;  %408 = vperm.xlu0 %743, %v400_v34  }
 0x1b5   : > { %v402_v49 = vmul.f32 1.442695, %v401_v35 }
 0x1ba   : > { %v481_v0 = vld [vmem:[#allocation2] sm:$0xff] }
 0x232   : > { %v409_v36 = vpop.permute.xlu0 %408 }
 0x233   : > { %v411_v38 = vsub.f32 %v393_v30, %v409_v36 }
 0x235   : > { %v412_v39 = vmul.f32 1.442695, %v411_v38 }
 0x237   : > { %745 = vpow2.f32 %v412_v39 }
 0x238   : > { %747 = vpow2.f32 %v402_v49 }
 0x239   : > { %749 = vrcp.f32 %v487_v58 }
 0x241   : > { %v746_v46 = vpop.eup %745 }
 0x242   : > { %v451_v47 = vsel %vm448_vm4, %v746_v46, 0.0  ;;  %v748_v50 = vpop.eup %747 }
 0x243   : > { %452 = vadd.xlane.f32.xlu1 %v451_v47  ;;  %v450_v52 = vmul.f32 %v748_v50, %v449_v51  ;;  %v750_v60 = vpop.eup %749 }
 0x247   : > { %459 = vadd.xlane.f32.xlu1 %v458_v48 }
 0x2d0   : > { %v453_v53 = vpop.xlane.xlu1 %452 }
 0x2d1   : > { %v454_v54 = vadd.f32 %v453_v53, %v450_v52 }
 0x2d3   : > { %455 = vst.msk [vmem:[#allocation3] sm:$0xff] %vm306_vm0, %v454_v54 }
 0x2d4   : > { %v460_v56 = vpop.xlane.xlu1 %459 }
 0x2d5   : > { %v461_v57 = vadd.f32 %v460_v56, %v457_v55 }
 0x2d7   : > { %462 = vst.msk [vmem:[#allocation4] sm:$0xff] %vm306_vm0, %v461_v57 }
 0x2da   : > { %v482_v59 = vld [vmem:[#allocation3] sm:$0xff] }
 0x2db   : > { %751 = vlog2.f32 %v482_v59 }
 0x2de   : > { %v486_v62 = vld [vmem:[#allocation4] sm:$0xff] }
 0x2df   : > { %v489_v2 = vmul.f32 %v750_v60, %v486_v62 }
 0x2e5   : > { %v752_v61 = vpop.eup %751 }
 0x2e6   : > { %v484_v63 = vmul.f32 0.6931472, %v752_v61 }
 0x2e8   : > { %v485_v1 = vadd.f32 %v484_v63, %v481_v0 }
 0x2ea   : > { %v490_v3 = vsub.f32 %v489_v2, %v485_v1 }
 0x2ec   : > { %v491_v4 = vmul.f32 -1.0, %v490_v3 }
 0x2ee   : > { %492 = vst.msk [vmem:[%s301_s9] sm:$0xff] %vm306_vm0, %v491_v4 }
 0x2ef PF: > { %s16_s20 = sadd.s32 1, %s807_s20   ;;  %s960_s18 = smov %s803_s19 }
 0x2f0   : > { %p13_p4 = scmp.ge.s32.totalorder %s16_s20, 4   ;;  %s961_s19 = smov %s963_s22 }
 0x2f2   :  { %15 = sbr.rel (!%p13_p4) target bundleno = 2 (0x2), region = 101 }
 0x2f9   :  { %512 = vsyncpa [#allocation6], 1 }
 0x2fa   :  { %514 = vsyncpa [#allocation6 + $0x1], 1 }

</bundles_post_ra>
